<compile_context>
chip_gen: v7x
topology: tpu7x:2x2x1
jax: 0.10.0
libtpu: 0.0.40
codegen_flags: <defaults>
</compile_context>

<pallas_src>
import numpy as np
import jax
import jax.numpy as jnp
from jax.experimental import pallas as pl
from jax.experimental.pallas import tpu as pltpu

_BN_EPS = 1e-5


def _round_up(x, m):
    return (x + m - 1) // m * m


def _pick_tile(size, candidates):
    for c in candidates:
        if size % c == 0:
            return c
    raise ValueError(f"no tile in {candidates} divides {size}")


def _vmem_limit_bytes():
    """~half of physical VMEM: 64 MiB on 128-MiB parts (v5e/v6e), 32 MiB on v7x."""
    cap = 64 * 1024 * 1024
    try:
        info = pltpu.get_tpu_info()
        c = getattr(info, "vmem_capacity_bytes", None)
        if c:
            cap = int(c)
    except Exception:
        pass
    return int(min(max(cap // 2, 32 * 1024 * 1024), 96 * 1024 * 1024))


_VMEM_LIMIT = _vmem_limit_bytes()


# ----------------------- generic fused matmul (+BN bias, +residual, +ReLU) -----------------------

def _make_mm_kernel(relu, has_res):
    def kernel(*refs):
        if has_res:
            a_ref, b_ref, s_ref, r_ref, o_ref, acc_ref = refs
        else:
            a_ref, b_ref, s_ref, o_ref, acc_ref = refs
            r_ref = None
        k = pl.program_id(2)

        @pl.when(k == 0)
        def _init():
            acc_ref[...] = jnp.zeros_like(acc_ref)

        acc_ref[...] += jnp.dot(a_ref[...], b_ref[...],
                                preferred_element_type=jnp.float32)

        @pl.when(k == pl.num_programs(2) - 1)
        def _finalize():
            y = acc_ref[...] + s_ref[...]          # folded BN bias (f32 epilogue)
            if r_ref is not None:
                y = y + r_ref[...].astype(jnp.float32)
            if relu:
                y = jnp.maximum(y, 0.0)
            o_ref[...] = y.astype(o_ref.dtype)

    return kernel


_MM_KERNELS = {(relu, res): _make_mm_kernel(relu, res)
               for relu in (False, True) for res in (False, True)}


def fused_matmul_bn(a, w, bias, *, relu, residual=None, out_dtype=jnp.bfloat16):
    """(M,K)bf16 @ (K,N)bf16 -> (M,N) with fused bias [+residual] [+ReLU]. f32 accumulate."""
    M, K = a.shape
    K2, N = w.shape
    assert K == K2 and bias.shape == (1, N)
    assert K % 128 == 0 and N % 128 == 0

    if M > 512:
        TM = 512
        Mp = _round_up(M, TM)
    elif M > 256:
        TM = 256
        Mp = _round_up(M, TM)
    else:
        Mp = _round_up(M, 8)
        TM = Mp
    TK = _pick_tile(K, (512, 384, 256, 128))
    TN = _pick_tile(N, (512, 256, 128))
    # Guarantee >=2 blocks on a parallel axis so dual-TensorCore parts (v7x) get work.
    if (Mp // TM) * (N // TN) < 2:
        if TN > 128:
            TN //= 2
        elif TM > 8 and TM % 16 == 0:
            TM //= 2

    a_p = a if Mp == M else jnp.pad(a, ((0, Mp - M), (0, 0)))
    args = [a_p, w, bias]
    in_specs = [
        pl.BlockSpec((TM, TK), lambda i, j, k: (i, k)),
        pl.BlockSpec((TK, TN), lambda i, j, k: (k, j)),
        pl.BlockSpec((1, TN), lambda i, j, k: (0, j)),
    ]
    has_res = residual is not None
    if has_res:
        r = residual.astype(jnp.bfloat16)
        if Mp != M:
            r = jnp.pad(r, ((0, Mp - M), (0, 0)))
        args.append(r)
        in_specs.append(pl.BlockSpec((TM, TN), lambda i, j, k: (i, j)))

    flops = 2 * Mp * N * K
    bytes_accessed = (Mp * K + K * N + Mp * N) * 2 + N * 4 + (Mp * N * 2 if has_res else 0)

    out = pl.pallas_call(
        _MM_KERNELS[(bool(relu), has_res)],
        out_shape=jax.ShapeDtypeStruct((Mp, N), out_dtype),
        grid=(Mp // TM, N // TN, K // TK),
        in_specs=in_specs,
        out_specs=pl.BlockSpec((TM, TN), lambda i, j, k: (i, j)),
        scratch_shapes=[pltpu.VMEM((TM, TN), jnp.float32)],
        compiler_params=pltpu.CompilerParams(
            dimension_semantics=("parallel", "parallel", "arbitrary"),
            vmem_limit_bytes=_VMEM_LIMIT,
        ),
        cost_estimate=pl.CostEstimate(flops=int(flops), transcendentals=0,
                                      bytes_accessed=int(bytes_accessed)),
    )(*args)
    return out if Mp == M else out[:M]


# ----------------------- fused stride-1 3x3 conv (no im2col) -----------------------
#
# The padded activation is flattened to (N, (H+3)*(W+2), C) (a free XLA reshape).  For tap
# (dy,dx) the im2col row for output (h,w) is exactly flat row dy*(W+2)+dx + h*(W+2)+w, so each
# tap is a contiguous 2-D row-slice of the flat block -> 9 MXU matmuls into one f32 accumulator.
# Rows that correspond to the two padded columns are computed but never stored.

def _make_conv3_kernel(relu, H, W):
    Wp = W + 2
    L = H * Wp

    def kernel(x_ref, w_ref, s_ref, o_ref, acc_ref):
        k = pl.program_id(2)

        @pl.when(k == 0)
        def _init():
            acc_ref[...] = jnp.zeros_like(acc_ref)

        acc = acc_ref[...]
        for dy in range(3):
            for dx in range(3):
                s = dy * Wp + dx
                a = x_ref[0, s:s + L, :]
                acc = acc + jnp.dot(a, w_ref[dy, dx],
                                    preferred_element_type=jnp.float32)
        acc_ref[...] = acc

        @pl.when(k == pl.num_programs(2) - 1)
        def _finalize():
            y = acc_ref[...] + s_ref[...]
            if relu:
                y = jnp.maximum(y, 0.0)
            yc = y.astype(o_ref.dtype)
            for h in range(H):                       # drop the 2 padded columns per row
                o_ref[0, h, :, :] = yc[h * Wp:h * Wp + W, :]

    return kernel


def _conv3_tiles(N, H, W, Cs, Coutp):
    """Pick (TK, TN) for the fused 3x3 path; None => does not fit VMEM, use im2col fallback."""
    Wp, Hp = W + 2, H + 3
    L = H * Wp
    budget = int(0.7 * _VMEM_LIMIT)
    for tk in (512, 256, 128):
        if Cs % tk:
            continue
        for tn in (512, 256, 128):
            if Coutp % tn:
                continue
            est = (2 * (Hp * Wp * tk * 2 + 9 * tk * tn * 2 + H * W * tn * 2)
                   + L * tn * 4)
            if est <= budget:
                # keep >=2 blocks on a parallel axis for dual-TC parts
                if N * (Coutp // tn) < 2 and tn > 128:
                    tn //= 2
                return tk, tn
    return None


def conv3x3_s1_fused(x, fc, *, relu, tiles):
    N, H, W, Cs = x.shape
    Coutp = fc["w4"].shape[-1]
    tk, tn = tiles
    Wp, Hp = W + 2, H + 3
    L = H * Wp
    xp = jnp.pad(x.astype(jnp.bfloat16), ((0, 0), (1, 2), (1, 1), (0, 0)))
    xpf = xp.reshape(N, Hp * Wp, Cs)

    flops = 2 * N * H * W * Cs * Coutp * 9
    bytes_accessed = (N * Hp * Wp * Cs + 9 * Cs * Coutp + N * H * W * Coutp) * 2

    out = pl.pallas_call(
        _make_conv3_kernel(bool(relu), H, W),
        out_shape=jax.ShapeDtypeStruct((N, H, W, Coutp), jnp.bfloat16),
        grid=(N, Coutp // tn, Cs // tk),
        in_specs=[
            pl.BlockSpec((1, Hp * Wp, tk), lambda b, j, k: (b, 0, k)),
            pl.BlockSpec((3, 3, tk, tn), lambda b, j, k: (0, 0, k, j)),
            pl.BlockSpec((1, tn), lambda b, j, k: (0, j)),
        ],
        out_specs=pl.BlockSpec((1, H, W, tn), lambda b, j, k: (b, 0, 0, j)),
        scratch_shapes=[pltpu.VMEM((L, tn), jnp.float32)],
        compiler_params=pltpu.CompilerParams(
            dimension_semantics=("parallel", "parallel", "arbitrary"),
            vmem_limit_bytes=_VMEM_LIMIT,
        ),
        cost_estimate=pl.CostEstimate(flops=int(flops), transcendentals=0,
                                      bytes_accessed=int(bytes_accessed)),
    )(xpf, fc["w4"], fc["b"])
    return out


# ------------------------------ conv dispatcher ------------------------------

def conv_bn(x, fc, *, relu, residual=None):
    """Conv2d(no bias)+folded BN [+residual] [+ReLU]. x: (N,H,W,Cstored), Cstored==fc['cin_pad']."""
    N, H, W, Cs = x.shape
    KH, KW, stride, pad = fc["kh"], fc["kw"], fc["stride"], fc["pad"]
    assert Cs == fc["cin_pad"]
    Ho = (H + 2 * pad - KH) // stride + 1
    Wo = (W + 2 * pad - KW) // stride + 1
    Np = fc["w"].shape[1]

    # Fused, im2col-free path for stride-1 3x3 convs.
    if (KH == 3 and KW == 3 and stride == 1 and pad == 1
            and residual is None and "w4" in fc):
        tiles = _conv3_tiles(N, H, W, Cs, Np)
        if tiles is not None:
            return conv3x3_s1_fused(x, fc, relu=relu, tiles=tiles)

    if KH == 1 and KW == 1 and pad == 0:
        # TODO(synk): the stride-2 decimation still makes one quarter-size XLA copy.
        xs = x if stride == 1 else x[:, ::stride, ::stride, :]
        a = xs.reshape(N * Ho * Wo, Cs)
    else:
        # TODO(synk): im2col retained only for the 7x7 stem and stride-2 3x3 convs.
        xp = jnp.pad(x, ((0, 0), (pad, pad), (pad, pad), (0, 0)))
        cols = [xp[:, dy:dy + stride * Ho:stride, dx:dx + stride * Wo:stride, :]
                for dy in range(KH) for dx in range(KW)]
        a = jnp.concatenate(cols, axis=-1).reshape(N * Ho * Wo, KH * KW * Cs)

    a = a.astype(jnp.bfloat16)
    Kp = fc["w"].shape[0]
    if a.shape[1] != Kp:                      # only the 3-channel stem needs K padding
        a = jnp.zeros((a.shape[0], Kp), jnp.bfloat16).at[:, :a.shape[1]].set(a)

    res2d = None
    if residual is not None:
        res2d = residual.reshape(N * Ho * Wo, Np)

    out = fused_matmul_bn(a, fc["w"], fc["b"], relu=relu, residual=res2d)
    return out.reshape(N, Ho, Wo, Np)


# ------------------------------ max pool 3x3 / s2 / p1 ------------------------------
# x is fed once via a free parity reshape (N, Hh, 2, Wh, 2C); the shifted window terms are
# applied in-kernel by updating interior output slices (no -inf halo copies in HBM).

def _maxpool_kernel(xe_ref, xo_ref, o_ref):
    C = o_ref.shape[3]
    xe = xe_ref[0, :, 0, :, :]                       # even input rows, (Hh, Wh, 2C)
    xo = xo_ref[0, :, 0, :, :]                       # odd input rows
    ee = xe[:, :, :C]
    eo = xe[:, :, C:]
    oe = xo[:, :, :C]
    oo = xo[:, :, C:]
    o_ref[0] = jnp.maximum(jnp.maximum(ee, eo), jnp.maximum(oe, oo))
    t01 = jnp.maximum(eo, oo)                        # contributions from column j-1
    o_ref[0, :, 1:, :] = jnp.maximum(o_ref[0, :, 1:, :], t01[:, :-1, :])
    t10 = jnp.maximum(oe, oo)                        # contributions from row i-1
    o_ref[0, 1:, :, :] = jnp.maximum(o_ref[0, 1:, :, :], t10[:-1, :, :])
    o_ref[0, 1:, 1:, :] = jnp.maximum(o_ref[0, 1:, 1:, :], oo[:-1, :-1, :])


def maxpool_3x3_s2(x):
    """MaxPool2d(kernel=3, stride=2, padding=1), parity decomposition read directly from x."""
    N, H, W, C = x.shape
    assert H % 2 == 0 and W % 2 == 0, "maxpool path assumes even spatial dims"
    Hh, Wh = H // 2, W // 2
    x7 = x.reshape(N, Hh, 2, Wh, 2 * C)              # free reshape: row/col parity packed
    return pl.pallas_call(
        _maxpool_kernel,
        out_shape=jax.ShapeDtypeStruct((N, Hh, Wh, C), x.dtype),
        grid=(N,),
        in_specs=[
            pl.BlockSpec((1, Hh, 1, Wh, 2 * C), lambda n: (n, 0, 0, 0, 0)),  # even rows
            pl.BlockSpec((1, Hh, 1, Wh, 2 * C), lambda n: (n, 0, 1, 0, 0)),  # odd rows
        ],
        out_specs=pl.BlockSpec((1, Hh, Wh, C), lambda n: (n, 0, 0, 0)),
        compiler_params=pltpu.CompilerParams(
            dimension_semantics=("parallel",),
            vmem_limit_bytes=_VMEM_LIMIT,
        ),
    )(x7, x7)


# ----------------------- fused bilinear upsample (align_corners=False) ---------------------

def _upsample_phases(f):
    ph = []
    for r in range(f):
        off = (2 * r + 1 - f) / (2.0 * f)
        if off < 0:
            ph.append((True, float(-off), float(1.0 + off)))    # wa*x[k-1] + wb*x[k]
        else:
            ph.append((False, float(1.0 - off), float(off)))    # wa*x[k]   + wb*x[k+1]
    return ph


def _make_upsample_kernel(f, H, W):
    phases = _upsample_phases(f)

    def kern(x_ref, o_ref):
        x = x_ref[0].astype(jnp.float32)             # (H+2, W+2, C) edge-padded
        for rh, (ph, wa, wb) in enumerate(phases):
            a = x[0:H] if ph else x[1:H + 1]
            b = x[1:H + 1] if ph else x[2:H + 2]
            yh = wa * a + wb * b                     # (H, W+2, C)
            for rw, (pw, va, vb) in enumerate(phases):
                l = yh[:, 0:W, :] if pw else yh[:, 1:W + 1, :]
                r = yh[:, 1:W + 1, :] if pw else yh[:, 2:W + 2, :]
                o_ref[0, :, rh, :, rw, :] = (va * l + vb * r).astype(o_ref.dtype)

    return kern


def bilinear_upsample(x, factor):
    """Single-kernel separable 2-tap lerp; PyTorch bilinear align_corners=False semantics."""
    N, H, W, C = x.shape
    f = int(factor)
    if f == 1:
        return x
    xp = jnp.pad(x, ((0, 0), (1, 1), (1, 1), (0, 0)), mode="edge")   # tiny stride-16 map
    out = pl.pallas_call(
        _make_upsample_kernel(f, H, W),
        out_shape=jax.ShapeDtypeStruct((N, H, f, W, f, C), x.dtype),
        grid=(N,),
        in_specs=[pl.BlockSpec((1, H + 2, W + 2, C), lambda n: (n, 0, 0, 0))],
        out_specs=pl.BlockSpec((1, H, f, W, f, C), lambda n: (n, 0, 0, 0, 0, 0)),
        compiler_params=pltpu.CompilerParams(
            dimension_semantics=("parallel",),
            vmem_limit_bytes=_VMEM_LIMIT,
        ),
    )(xp)
    return out.reshape(N, H * f, W * f, C)            # free reshape


# ------------------------------ parameter building ------------------------------

def make_bn(key, c):
    k1, k2, k3, k4 = jax.random.split(key, 4)
    return {
        "gamma": jax.random.uniform(k1, (c,), jnp.float32, 0.5, 1.5),
        "beta": jax.random.normal(k2, (c,), jnp.float32) * 0.1,
        "mean": jax.random.normal(k3, (c,), jnp.float32) * 0.1,
        "var": jax.random.uniform(k4, (c,), jnp.float32, 0.5, 1.5),
    }


def fold_conv_bn(w_oihw, bn, cin_pad):
    """Fold inference BN into the conv weights; pad K/N to 128 multiples; cast bf16."""
    Cout, Cin, KH, KW = w_oihw.shape
    cout_pad = _round_up(Cout, 128)
    scale = bn["gamma"] / jnp.sqrt(bn["var"] + _BN_EPS)
    shift = bn["beta"] - bn["mean"] * scale
    w4 = jnp.zeros((KH, KW, cin_pad, cout_pad), jnp.float32)
    w4 = w4.at[:, :, :Cin, :Cout].set(
        jnp.transpose(w_oihw, (2, 3, 1, 0)) * scale[None, None, None, :])
    K = KH * KW * cin_pad
    Kp = _round_up(K, 128)
    wmat = w4.reshape(K, cout_pad)
    if Kp != K:
        wmat = jnp.zeros((Kp, cout_pad), jnp.float32).at[:K].set(wmat)
    bias = jnp.zeros((1, cout_pad), jnp.float32).at[0, :Cout].set(shift)
    d = {"w": wmat.astype(jnp.bfloat16), "b": bias,
         "kh": KH, "kw": KW, "cin_pad": cin_pad, "cout": Cout}
    if KH == 3 and KW == 3:
        d["w4"] = w4.astype(jnp.bfloat16)             # per-tap weights for the fused 3x3 path
    return d


def make_conv_bn(key, cout, cin, kh, kw, *, stride, pad, cin_pad):
    kconv, kbn = jax.random.split(key)
    w = jax.random.normal(kconv, (cout, cin, kh, kw), jnp.float32) / float(np.sqrt(cin * kh * kw))
    fc = fold_conv_bn(w, make_bn(kbn, cout), cin_pad)
    fc["stride"] = stride
    fc["pad"] = pad
    return fc


def make_bottleneck(key, inplanes, planes, stride):
    ks = jax.random.split(key, 4)
    inp_p = _round_up(inplanes, 128)
    pl_p = _round_up(planes, 128)
    p = {
        "c1": make_conv_bn(ks[0], planes, inplanes, 1, 1, stride=1, pad=0, cin_pad=inp_p),
        "c2": make_conv_bn(ks[1], planes, planes, 3, 3, stride=stride, pad=1, cin_pad=pl_p),
        "c3": make_conv_bn(ks[2], planes * 4, planes, 1, 1, stride=1, pad=0, cin_pad=pl_p),
    }
    if stride != 1 or inplanes != planes * 4:
        p["ds"] = make_conv_bn(ks[3], planes * 4, inplanes, 1, 1, stride=stride, pad=0,
                               cin_pad=inp_p)
    return p


def make_resnet_features_params(key, blocks=(1, 1, 1, 1), output_stride=16):
    keys = iter(jax.random.split(key, 64))
    params = {"stem": make_conv_bn(next(keys), 64, 3, 7, 7, stride=2, pad=3, cin_pad=3)}
    inplanes = 64
    cfg = [(64, blocks[0], 1), (128, blocks[1], 2), (256, blocks[2], 2), (512, blocks[3], 2)]
    for li, (planes, nb, stride) in enumerate(cfg, start=1):
        # Mirror the PyTorch wrapper: output_stride==16 forces layer4 conv2/downsample strides
        # to 1; output_stride==8 forces layer3 and layer4.
        eff = stride
        if output_stride == 16 and li == 4:
            eff = 1
        if output_stride == 8 and li in (3, 4):
            eff = 1
        blks = []
        for b in range(nb):
            s = eff if b == 0 else 1
            blks.append(make_bottleneck(next(keys), inplanes, planes, s))
            inplanes = planes * 4
        params[f"layer{li}"] = blks
    # reduce_dim: 2048->512 (1x1), 512->256 (3x3,p1), 256->32 (1x1), each BN+ReLU.
    params["rd1"] = make_conv_bn(next(keys), 512, 2048, 1, 1, stride=1, pad=0, cin_pad=2048)
    params["rd2"] = make_conv_bn(next(keys), 256, 512, 3, 3, stride=1, pad=1, cin_pad=512)
    params["rd3"] = make_conv_bn(next(keys), 32, 256, 1, 1, stride=1, pad=0, cin_pad=256)
    return params


# ------------------------------------ forward ------------------------------------

def bottleneck_forward(x, p):
    out = conv_bn(x, p["c1"], relu=True)
    out = conv_bn(out, p["c2"], relu=True)
    if "ds" in p:
        identity = conv_bn(x, p["ds"], relu=False)
    else:
        identity = x
    # conv3 + bn3 + residual add + ReLU, all in the matmul epilogue
    return conv_bn(out, p["c3"], relu=True, residual=identity)


def resnet_features_forward(params, x_nchw, output_stride=16):
    x = jnp.transpose(x_nchw.astype(jnp.float32), (0, 2, 3, 1))      # NCHW -> NHWC (3 ch)
    x = conv_bn(x, params["stem"], relu=True)                        # -> (N,H/2,W/2,128) bf16
    x = maxpool_3x3_s2(x)
    for name in ("layer1", "layer2", "layer3", "layer4"):
        for blk in params[name]:
            x = bottleneck_forward(x, blk)
    x = conv_bn(x, params["rd1"], relu=True)
    x = conv_bn(x, params["rd2"], relu=True)
    x = conv_bn(x, params["rd3"], relu=True)
    current_stride = 32 if output_stride == 32 else 16
    if current_stride > 4:
        x = bilinear_upsample(x, current_stride // 4)
    x = x[..., :params["rd3"]["cout"]].astype(jnp.float32)           # drop lane padding
    return jnp.transpose(x, (0, 3, 1, 2))                            # NHWC -> NCHW


if __name__ == "__main__":
    key = jax.random.PRNGKey(0)
    pkey, xkey = jax.random.split(key)
    output_stride = 16
    # Small synthetic backbone: Bottleneck layers [1,1,1,1] with the standard channel plan
    # (256/512/1024/2048) so reduce_dim's 2048-channel input matches the wrapper.
    params = make_resnet_features_params(pkey, blocks=(1, 1, 1, 1), output_stride=output_stride)
    x = jax.random.normal(xkey, (2, 3, 32, 32), jnp.float32)         # NCHW input, like PyTorch
    y = resnet_features_forward(params, x, output_stride=output_stride)
    y = jax.block_until_ready(y)
    assert y.shape == (2, 32, 8, 8), y.shape                         # stride-4 features, 32 ch
    assert bool(jnp.all(jnp.isfinite(y)))
    print("KERNEL_OK")
</pallas_src>

<mosaic_0001>
module attributes {stable_mosaic.version = 11 : i64} {
  func.func @kernel(%arg0: i32, %arg1: i32, %arg2: i32, %arg3: memref<256x256xbf16, #tpu.memory_space<vmem>>, %arg4: memref<256x128xbf16, #tpu.memory_space<vmem>>, %arg5: memref<1x128xf32, #tpu.memory_space<vmem>>, %arg6: memref<256x128xbf16, #tpu.memory_space<vmem>>, %arg7: memref<256x128xf32, #tpu.memory_space<vmem>>) attributes {dimension_semantics = [#tpu.dimension_semantics<parallel>, #tpu.dimension_semantics<parallel>, #tpu.dimension_semantics<arbitrary>], iteration_bounds = array<i64: 2, 1, 1>, scalar_prefetch = 0 : i64, scratch_operands = 1 : i64, tpu.core_type = #tpu.core_type<tc>, window_params = [{transform_indices = @transform_0, window_bounds = array<i64: 256, 256>}, {transform_indices = @transform_1, window_bounds = array<i64: 256, 128>}, {transform_indices = @transform_2, window_bounds = array<i64: 1, 128>}, {transform_indices = @transform_3, window_bounds = array<i64: 256, 128>}]} {
    %c0_i32 = arith.constant 0 : i32
    %0 = arith.cmpi eq, %arg2, %c0_i32 : i32
    %1 = arith.extui %0 : i1 to i32
    %c0_i32_0 = arith.constant 0 : i32
    %2 = arith.cmpi ne, %1, %c0_i32_0 : i32
    scf.if %2 {
      %cst_10 = arith.constant 0.000000e+00 : f32
      %12 = vector.broadcast %cst_10 : f32 to vector<256x128xf32>
      %c0_11 = arith.constant 0 : index
      %c0_12 = arith.constant 0 : index
      %13 = vector.load %arg7[%c0_11, %c0_12] : memref<256x128xf32, #tpu.memory_space<vmem>>, vector<256x128xf32>
      tpu.vector_store %arg7[%c0_11, %c0_12], %12 {strides = array<i32>} : memref<256x128xf32, #tpu.memory_space<vmem>>, vector<256x128xf32>,
    } else {
    }
    %c0 = arith.constant 0 : index
    %c0_1 = arith.constant 0 : index
    %3 = vector.load %arg7[%c0, %c0_1] : memref<256x128xf32, #tpu.memory_space<vmem>>, vector<256x128xf32>
    %c0_2 = arith.constant 0 : index
    %c0_3 = arith.constant 0 : index
    %4 = vector.load %arg3[%c0_2, %c0_3] : memref<256x256xbf16, #tpu.memory_space<vmem>>, vector<256x256xbf16>
    %c0_4 = arith.constant 0 : index
    %c0_5 = arith.constant 0 : index
    %5 = vector.load %arg4[%c0_4, %c0_5] : memref<256x128xbf16, #tpu.memory_space<vmem>>, vector<256x128xbf16>
    %cst = arith.constant dense<0.000000e+00> : vector<256x128xf32>
    %6 = tpu.matmul %4, %5, %cst {dimension_numbers = #tpu.dot_dimension_numbers<[1], [0], [0], [1], [0, 0, 1, 1], [], []>} : vector<256x256xbf16>, vector<256x128xbf16>, vector<256x128xf32> -> vector<256x128xf32>
    %7 = arith.addf %3, %6 : vector<256x128xf32>
    %c0_6 = arith.constant 0 : index
    %c0_7 = arith.constant 0 : index
    %8 = vector.load %arg7[%c0_6, %c0_7] : memref<256x128xf32, #tpu.memory_space<vmem>>, vector<256x128xf32>
    tpu.vector_store %arg7[%c0_6, %c0_7], %7 {strides = array<i32>} : memref<256x128xf32, #tpu.memory_space<vmem>>, vector<256x128xf32>,
    %c0_i32_8 = arith.constant 0 : i32
    %9 = arith.cmpi eq, %arg2, %c0_i32_8 : i32
    %10 = arith.extui %9 : i1 to i32
    %c0_i32_9 = arith.constant 0 : i32
    %11 = arith.cmpi ne, %10, %c0_i32_9 : i32
    scf.if %11 {
      %c0_10 = arith.constant 0 : index
      %c0_11 = arith.constant 0 : index
      %12 = vector.load %arg7[%c0_10, %c0_11] : memref<256x128xf32, #tpu.memory_space<vmem>>, vector<256x128xf32>
      %c0_12 = arith.constant 0 : index
      %c0_13 = arith.constant 0 : index
      %13 = vector.load %arg5[%c0_12, %c0_13] : memref<1x128xf32, #tpu.memory_space<vmem>>, vector<1x128xf32>
      %14 = vector.broadcast %13 : vector<1x128xf32> to vector<256x128xf32>
      %15 = arith.addf %12, %14 : vector<256x128xf32>
      %cst_14 = arith.constant 0.000000e+00 : f32
      %16 = vector.broadcast %cst_14 : f32 to vector<256x128xf32>
      %17 = arith.maximumf %15, %16 : vector<256x128xf32>
      %18 = arith.truncf %17 : vector<256x128xf32> to vector<256x128xbf16>
      %c0_15 = arith.constant 0 : index
      %c0_16 = arith.constant 0 : index
      %19 = vector.load %arg6[%c0_15, %c0_16] : memref<256x128xbf16, #tpu.memory_space<vmem>>, vector<256x128xbf16>
      tpu.vector_store %arg6[%c0_15, %c0_16], %18 {strides = array<i32>} : memref<256x128xbf16, #tpu.memory_space<vmem>>, vector<256x128xbf16>,
    } else {
    }
    return
  }
  func.func @transform_0(%arg0: i32, %arg1: i32, %arg2: i32) -> (i32, i32) {
    %c0_i32 = arith.constant 0 : i32
    return %arg0, %arg2 : i32, i32
  }
  func.func @transform_1(%arg0: i32, %arg1: i32, %arg2: i32) -> (i32, i32) {
    %c0_i32 = arith.constant 0 : i32
    return %arg2, %arg1 : i32, i32
  }
  func.func @transform_2(%arg0: i32, %arg1: i32, %arg2: i32) -> (i32, i32) {
    %c0_i32 = arith.constant 0 : i32
    %c0_i32_0 = arith.constant 0 : i32
    return %c0_i32, %arg1 : i32, i32
  }
  func.func @transform_3(%arg0: i32, %arg1: i32, %arg2: i32) -> (i32, i32) {
    %c0_i32 = arith.constant 0 : i32
    return %arg0, %arg1 : i32, i32
  }
}

</mosaic_0001>

<bundles_post_ra>
// kernel: tpu_custom_call.1
= control target key start
LH: loop header
LB: loop body
LE: loop exit
PB: predicated region body
PF: predicated region fallthrough
CT: control target
= control target key end

     0   :  { %8 = vsyncpa [#allocation4], 0  ;;  %s2255_s0 = inlined_call_operand.hbm [shape: bf16[512,256], index: 0, kind: input, shape index: {}]   ;;  %s2256_s1 = inlined_call_operand.hbm [shape: bf16[256,128], index: 1, kind: input, shape index: {}]   ;;  %s2257_s2 = inlined_call_operand.vmem [shape: f32[1,128], index: 2, kind: input, shape index: {}]   ;;  %s2258_s3 = inlined_call_operand.hbm [shape: bf16[512,128], index: 3, kind: output, shape index: {}]  }
   0x1   :  { %10 = vsyncpa [#allocation4 + $0x1], 0 }
   0x2   :  { %11 = vsyncpa [#allocation7], 0 }
   0x3   :  { %12 = vsyncpa [#allocation5], 0 }
   0x4   :  { %14 = vsyncpa [#allocation5 + $0x1], 0  ;;  %s1945_s12 = smov 0   ;;  %s1947_s13 = smov 0  }
   0x5   :  { %s1949_s14 = smov 0   ;;  %s1951_s15 = smov 0  }
   0x6   :  { %s1953_s16 = smov 0   ;;  %s1955_s17 = smov 0  }
   0x7 LB: > { %s1269_s18 = sadd.s32 4294967295, %s1914_s17   ;;  %s1270_s19 = sadd.s32 4294967294, %s1914_s17   ;;  %s1914_s17 = sphi %s1955_s17, %s20_s17   ;;  %s1910_s16 = sphi %s1953_s16, %s2282_s16   ;;  %s1906_s15 = sphi %s1951_s15, %s2281_s15   ;;  %s1902_s14 = sphi %s1949_s14, %s2280_s14   ;;  %s1898_s13 = sphi %s1947_s13, %s2279_s13   ;;  %s1894_s12 = sphi %s1945_s12, %s2278_s12  }
   0x8   : > { %p61_p0 = scmp.ne.s32.totalorder %s1898_s13, %s1894_s12  ;;  %p1979_p1 = scmp.eq.s32.totalorder %s1269_s18, 0 }
   0x9   : > { %p1983_p2 = scmp.eq.s32.totalorder %s1269_s18, 1  ;;  %p147_p3 = scmp.eq.s32.totalorder %s1270_s19, 1 }
   0xa   : > { %s2263_s20 = scalar_select %p1979_p1, 1, 0 }
   0xb   : > { %s2264_s21 = scalar_select %p1983_p2, 1, 0 }
   0xc   : > { %p1989_p4 = por %p1979_p1, %p61_p0  ;;  %p1271_p5 = scmp.ge.s32.totalorder %s1914_s17, 1 }
   0xd   : > { %p1994_p6 = por %p147_p3, %p61_p0  ;;  %p154_p7 = scmp.lt.s32.totalorder %s1914_s17, 3 }
   0xe   : > { %s2265_s22 = scalar_select %p1989_p4, 1, 0 }
   0xf   : > { %s2266_s23 = scalar_select %p1994_p6, 1, 0 }
  0x10   : > { %p1999_p8 = pnand %p1271_p5, %p154_p7  ;;  %s1916_s25 = smov [#allocation6]  }
  0x11   : > { %s170_s26 = sshll.u32 %s1916_s25, 4  ;;  %s39_s28 = sadd.s32 1, %s1910_s16  ;;  %s171_s26 = int_to_ptr.vmem [resolvable:$true] %s170_s26 }
  0x12   : > { %s2267_s24 = scalar_select %p1999_p8, 1, 0 }
  0x13   : > { %p1635_p9 = pneg %p1999_p8  ;;  %s1770_s4 = scalar_lea.hbm %s2256_s1, 2048 }
  0x14   : > { %p1771_p12 = scmp.ne.s32.totalorder %s2256_s1, %s1770_s4  ;;  %p1777_p5 = scmp.lt.u32.totalorder %s1770_s4, %s2256_s1 }
  0x15   : > { %p2008_p11 = pnand %p1635_p9, %p1979_p1 }
  0x17   : > { %p1772_p13 = pneg %p2008_p11 }
  0x19   : > { %p1773_p0 = pnand %p1772_p13, %p1771_p12 }
  0x1b   : > { %p1774_p3 = pneg %p1773_p0 }
  0x1d   : > { %p1779_p7 = pnand %p1777_p5, %p1774_p3 }
  0x1f   : > { %1782 = shalt.err (!%p1779_p7)
}
  0x20   : > { %s1783_s9 = scalar_lea.vmem %s171_s26, 2048  ;;  %p1791_p1 = scmp.lt.s32.totalorder %s171_s26, %s171_s26 }
  0x21   : > { %p1784_p9 = scmp.ne.s32.totalorder %s171_s26, %s1783_s9  ;;  %p1792_p4 = scmp.lt.s32.totalorder %s1783_s9, %s1783_s9 }
  0x23   : > { %p1786_p10 = pnand %p1784_p9, %p1772_p13  ;;  %p1793_p8 = por %p1792_p4, %p1791_p1 }
  0x25   : > { %p1787_p6 = pneg %p1786_p10 }
  0x27   : > { %p1794_p2 = pnand %p1793_p8, %p1787_p6 }
  0x29   : > { %1797 = shalt.err (!%p1794_p2)
}
  0x2a   : > { %s1917_s10 = smov 64   ;;  %s1918_s11 = smov 4  }
  0x2b   : > { %1638 = dma.hbm_to_vmem [thread:$0]  (!%p2008_p11), %s2256_s1, 2048, %s171_s26, [#allocation7], %s1917_s10, %s1917_s10, %s1918_s11  }
  0x2c   : > { %p41_p1 = scmp.ge.s32.totalorder %s39_s28, 2  ;;  %s48_s25 = sadd.s32 1, %s1902_s14 }
  0x2d   : > { %p55_p2 = scmp.ne.s32.totalorder %s1902_s14, %s1898_s13  ;;  %p56_p4 = scmp.eq.s32.totalorder %s1914_s17, 0 }
  0x2e   : > { %s2284_s28 = smov (%p41_p1, %s39_s28), 0  ;;  %p2270_p8 = scmp.ne.s32.totalorder %s2264_s21, 0 }
  0x2f   : > { %p2035_p6 = por %p56_p4, %p55_p2  ;;  %s43_s27 = ssub.s32 %s1910_s16, %s2284_s28 }
  0x30   : > { %p2041_p10 = por %p2270_p8, %p55_p2  ;;  %p1648_p12 = scmp.lt.s32.totalorder %s1914_s17, 2 }
  0x31   : > { %p46_p11 = scmp.eq.s32.totalorder %s43_s27, 0  ;;  %s190_s26 = sand.u32 1, %s1902_s14  }
  0x32   : > { %s1275_s4 = sshll.u32 %s190_s26, 8  ;;  %s1370_s6 = sshll.u32 %s1910_s16, 12 }
  0x33   : > { %s2050_s5 = scalar_select %p46_p11, %s1902_s14, %s48_s25  }
  0x34   : > { %s2056_s9 = scalar_lea.hbm %s2255_s0, %s1370_s6  ;;  %s194_s21 = scalar_lea.vmem [#allocation3], %s1275_s4 }
  0x35   : > { %s204_s10 = sshll.u32 %s194_s21, 4  ;;  %p2062_p13 = pnand %p1648_p12, %p2035_p6  ;;  %s2058_s10 = int_to_ptr.vmem [resolvable:$true] %s204_s10 }
  0x36   : > { %s2066_s18 = scalar_lea.sflag [#allocation4], %s190_s26  ;;  %s1798_s19 = scalar_lea.hbm %s2056_s9, 4096 }
  0x37   : > { %p1799_p0 = scmp.ne.s32.totalorder %s2056_s9, %s1798_s19  ;;  %p1800_p3 = pneg %p2062_p13 }
  0x38   : > { %s1803_s29 = scalar_lea.hbm %s2255_s0, 8192  ;;  %p1804_p9 = scmp.lt.u32.totalorder %s2056_s9, %s2255_s0 }
  0x39   : > { %p1801_p5 = pnand %p1800_p3, %p1799_p0  ;;  %p1805_p1 = scmp.lt.u32.totalorder %s1803_s29, %s1798_s19 }
  0x3a   : > { %p1807_p4 = scmp.lt.u32.totalorder %s1798_s19, %s2056_s9 }
  0x3b   : > { %p1802_p7 = pneg %p1801_p5  ;;  %p1806_p2 = por %p1805_p1, %p1804_p9 }
  0x3d   : > { %p1808_p6 = por %p1807_p4, %p1806_p2 }
  0x3f   : > { %p1809_p8 = pnand %p1808_p6, %p1802_p7 }
  0x41   : > { %1812 = shalt.err (!%p1809_p8)
}
  0x42   : > { %s1813_s26 = scalar_lea.vmem %s2058_s10, 4096  ;;  %s1919_s7 = smov [#allocation3]  }
  0x43   : > { %p1814_p12 = scmp.ne.s32.totalorder %s2058_s10, %s1813_s26  ;;  %s1818_s8 = sshll.u32 %s1919_s7, 4  ;;  %s1819_s8 = int_to_ptr.vmem [resolvable:$false] %s1818_s8 }
  0x44   : > { %s1820_s21 = scalar_lea.vmem %s1819_s8, 8192  ;;  %p1821_p5 = scmp.lt.s32.totalorder %s2058_s10, %s1819_s8 }
  0x45   : > { %p1816_p11 = pnand %p1814_p12, %p1800_p3  ;;  %p1822_p9 = scmp.lt.s32.totalorder %s1820_s21, %s1813_s26 }
  0x47   : > { %p1817_p0 = pneg %p1816_p11  ;;  %p1823_p1 = por %p1822_p9, %p1821_p5 }
  0x49   : > { %p1824_p2 = pnand %p1823_p1, %p1817_p0 }
  0x4b   : > { %1827 = shalt.err (!%p1824_p2)
}
  0x4c   : > { %s1920_s19 = smov 128   ;;  %s1921_s25 = smov 8  }
  0x4d   : > { %1642 = dma.hbm_to_vmem [thread:$0]  (!%p2062_p13), %s2056_s9, 4096, %s2058_s10, %s2066_s18, %s1920_s19, %s1920_s19, %s1921_s25  }
  0x4e   : > { %p2273_p3 = scmp.ne.s32.totalorder %s2267_s24, 0 }
  0x4f   : > { %s2097_s27 = sand.u32 (!%p2273_p3), 1, %s1898_s13   ;;  %p2274_p7 = scmp.ne.s32.totalorder (!%p2273_p3), %s2265_s22, 0 }
  0x50   : > { %216 = sbr.rel (%p2273_p3) target bundleno = 419 (0x1a3), region = 32  ;;  %s1280_s29 = sshll.u32 (!%p2273_p3), %s2097_s27, 8 }
  0x51   : > { %s219_s4 = scalar_lea.sflag (!%p2273_p3), [#allocation4], %s2097_s27  ;;  %s2101_s6 = scalar_lea.vmem (!%p2273_p3), [#allocation3], %s1280_s29 }
  0x57   : > { %1881 = dma.done.wait (%p2274_p7), %s219_s4, 4096  }
  0x58   : > { %1883 = vsyncadd (%p2274_p7), %s219_s4, 4294963200  ;;  %p2275_p13 = scmp.ne.s32.totalorder %s2263_s20, 0 }
  0x5a   : > { %1885 = dma.done.wait (%p2275_p13), [#allocation7], 2048  }
  0x5b   : > { %1887 = vsyncadd (%p2275_p13), [#allocation7], 4294965248  ;;  %v1706_v0 = vld [vmem:[#allocation6 + $0x40] sm:$0xff]   ;;  %v1708_v2 = vld [vmem:[#allocation6 + $0x48] sm:$0xff]   ;;  %s1282_s24 = sshll.u32 %s2097_s27, 7  ;;  %s1403_s10 = sshll.u32 %s1906_s15, 11 }
  0x5c   : > { %v1707_v1 = vld [vmem:[#allocation6] sm:$0xff]   ;;  %1499 = vmatprep.subr.bf16.mxu0 %v1706_v0  ;;  %1611 = vmatprep.subr.bf16.mxu1 %v1706_v0  ;;  %v1709_v3 = vld [vmem:[#allocation6 + $0x8] sm:$0xff]   ;;  %v1710_v4 = vld [vmem:[#allocation6 + $0x50] sm:$0xff]   ;;  %s2153_s9 = scalar_lea.vmem [#allocation8], %s1282_s24  ;;  %s2202_s7 = scalar_lea.hbm %s2258_s3, %s1403_s10 }
  0x5d   : > { %1500 = vmatpush3.bf16.msra.mxu0 %v1707_v1  ;;  %1619 = vmatpush3.bf16.msra.mxu1 %v1707_v1  ;;  %v1711_v5 = vld [vmem:[#allocation6 + $0x10] sm:$0xff]   ;;  %v1712_v6 = vld [vmem:[#allocation6 + $0x58] sm:$0xff]   ;;  %v1714_v8 = vld [vmem:[#allocation6 + $0x60] sm:$0xff]   ;;  %s1154_s11 = sshll.u32 %s2153_s9, 4  ;;  %s1140_s15 = scalar_lea.sflag [#allocation5], %s2097_s27  ;;  %s2204_s11 = int_to_ptr.vmem [resolvable:$true] %s1154_s11 }
  0x5e   : > { %1501 = vmatprep.subr.bf16.mxu0 %v1708_v2  ;;  %1612 = vmatprep.subr.bf16.mxu1 %v1708_v2  ;;  %v1713_v7 = vld [vmem:[#allocation6 + $0x18] sm:$0xff]   ;;  %v1715_v9 = vld [vmem:[#allocation6 + $0x20] sm:$0xff]   ;;  %v1716_v10 = vld [vmem:[#allocation6 + $0x68] sm:$0xff]   ;;  %s1828_s8 = scalar_lea.vmem %s2204_s11, 2048  ;;  %s1922_s21 = smov [#allocation8]  }
  0x5f   : > { %v1724_v11 = vld [vmem:[%s2101_s6 + $0x4] ss:$8 sps:$4 sm:$0xff]   ;;  %v1718_v14 = vld [vmem:[#allocation6 + $0x70] sm:$0xff]   ;;  %v1720_v16 = vld [vmem:[#allocation6 + $0x78] sm:$0xff]   ;;  %p1829_p4 = scmp.ne.s32.totalorder %s2204_s11, %s1828_s8  ;;  %s1832_s19 = sshll.u32 %s1922_s21, 4  ;;  %s1833_s19 = int_to_ptr.vmem [resolvable:$false] %s1832_s19 }
  0x60   : > { %v1727_v12 = vld [vmem:[%s2101_s6 + $0x84] ss:$8 sps:$4 sm:$0xff]   ;;  %680 = vmatprep.mubr.bf16.mxu0 %v1724_v11  ;;  %v1719_v15 = vld [vmem:[#allocation6 + $0x30] sm:$0xff]   ;;  %v1721_v17 = vld [vmem:[#allocation6 + $0x38] sm:$0xff]   ;;  %s1834_s25 = scalar_lea.vmem %s1833_s19, 4096  ;;  %p1835_p12 = scmp.lt.s32.totalorder %s2204_s11, %s1833_s19 }
  0x61   : > { %1502 = vmatpush3.bf16.msra.mxu0 %v1709_v3  ;;  %1620 = vmatpush3.bf16.msra.mxu1 %v1709_v3  ;;  %v1717_v13 = vld [vmem:[#allocation6 + $0x28] sm:$0xff]   ;;  %v1728_v20 = vld [vmem:[%s2101_s6 + $0x14] ss:$8 sps:$4 sm:$0xff]   ;;  %v1732_v22 = vld [vmem:[%s2101_s6 + $0x10] ss:$8 sps:$4 sm:$0xff]   ;;  %p1830_p6 = pnand %p1829_p4, %p2041_p10  ;;  %p1836_p11 = scmp.lt.s32.totalorder %s1834_s25, %s1828_s8 }
  0x62   : > { %1503 = vmatprep.subr.bf16.mxu0 %v1710_v4  ;;  %1613 = vmatprep.subr.bf16.mxu1 %v1710_v4  ;;  %v1722_v18 = vld [vmem:[%s2101_s6] ss:$8 sps:$4 sm:$0xff]   ;;  %v1730_v21 = vld [vmem:[%s2101_s6 + $0x94] ss:$8 sps:$4 sm:$0xff]   ;;  %v1733_v23 = vld [vmem:[%s2101_s6 + $0x90] ss:$8 sps:$4 sm:$0xff]  }
  0x63   : > { %744 = vmatprep.mubr.bf16.mxu1 %v1727_v12  ;;  %v1725_v19 = vld [vmem:[%s2101_s6 + $0x80] ss:$8 sps:$4 sm:$0xff]   ;;  %v1734_v24 = vld [vmem:[%s2101_s6 + $0x24] ss:$8 sps:$4 sm:$0xff]   ;;  %v1740_v28 = vld [vmem:[%s2101_s6 + $0x34] ss:$8 sps:$4 sm:$0xff]   ;;  %p1831_p8 = pneg %p1830_p6  ;;  %p1837_p0 = por %p1836_p11, %p1835_p12 }
  0x64   : > { %v1736_v25 = vld [vmem:[%s2101_s6 + $0xa4] ss:$8 sps:$4 sm:$0xff]   ;;  %v1738_v26 = vld [vmem:[%s2101_s6 + $0x20] ss:$8 sps:$4 sm:$0xff]   ;;  %v1742_v29 = vld [vmem:[%s2101_s6 + $0xb4] ss:$8 sps:$4 sm:$0xff]  }
  0x65   : > { %1504 = vmatpush3.bf16.msra.mxu0 %v1711_v5  ;;  %1621 = vmatpush3.bf16.msra.mxu1 %v1711_v5  ;;  %v1739_v27 = vld [vmem:[%s2101_s6 + $0xa0] ss:$8 sps:$4 sm:$0xff]   ;;  %v1744_v30 = vld [vmem:[%s2101_s6 + $0x30] ss:$8 sps:$4 sm:$0xff]   ;;  %v1746_v32 = vld [vmem:[%s2101_s6 + $0x44] ss:$8 sps:$4 sm:$0xff]   ;;  %p1838_p5 = pnand %p1837_p0, %p1831_p8 }
  0x66   : > { %1505 = vmatprep.subr.bf16.mxu0 %v1712_v6  ;;  %1614 = vmatprep.subr.bf16.mxu1 %v1712_v6  ;;  %v1745_v31 = vld [vmem:[%s2101_s6 + $0xb0] ss:$8 sps:$4 sm:$0xff]   ;;  %v1748_v33 = vld [vmem:[%s2101_s6 + $0xc4] ss:$8 sps:$4 sm:$0xff]   ;;  %v1750_v34 = vld [vmem:[%s2101_s6 + $0x40] ss:$8 sps:$4 sm:$0xff]  }
  0x67   : > { %v1751_v35 = vld [vmem:[%s2101_s6 + $0xc0] ss:$8 sps:$4 sm:$0xff]   ;;  %v1752_v36 = vld [vmem:[%s2101_s6 + $0x54] ss:$8 sps:$4 sm:$0xff]   ;;  %v1756_v38 = vld [vmem:[%s2101_s6 + $0x50] ss:$8 sps:$4 sm:$0xff]  }
  0x68   : > { %v1754_v37 = vld [vmem:[%s2101_s6 + $0xd4] ss:$8 sps:$4 sm:$0xff]   ;;  %v1757_v39 = vld [vmem:[%s2101_s6 + $0xd0] ss:$8 sps:$4 sm:$0xff]   ;;  %v1758_v40 = vld [vmem:[%s2101_s6 + $0x64] ss:$8 sps:$4 sm:$0xff]  }
  0x69   : > { %1506 = vmatpush3.bf16.msra.mxu0 %v1713_v7  ;;  %1622 = vmatpush3.bf16.msra.mxu1 %v1713_v7  ;;  %v1760_v41 = vld [vmem:[%s2101_s6 + $0xe4] ss:$8 sps:$4 sm:$0xff]   ;;  %v1762_v42 = vld [vmem:[%s2101_s6 + $0x60] ss:$8 sps:$4 sm:$0xff]   ;;  %v1764_v44 = vld [vmem:[%s2101_s6 + $0x74] ss:$8 sps:$4 sm:$0xff]  }
  0x6a   : > { %1507 = vmatprep.subr.bf16.mxu0 %v1714_v8  ;;  %1615 = vmatprep.subr.bf16.mxu1 %v1714_v8  ;;  %v1763_v43 = vld [vmem:[%s2101_s6 + $0xe0] ss:$8 sps:$4 sm:$0xff]   ;;  %v1766_v45 = vld [vmem:[%s2101_s6 + $0xf4] ss:$8 sps:$4 sm:$0xff]   ;;  %v1768_v46 = vld [vmem:[%s2101_s6 + $0x70] ss:$8 sps:$4 sm:$0xff]  }
  0x6b   : > { %v1769_v47 = vld [vmem:[%s2101_s6 + $0xf0] ss:$8 sps:$4 sm:$0xff]   ;;  %v2146_v51 = vld [vmem:[%s2257_s2] ss:$0 sm:$0xff] }
  0x6d   : > { %1508 = vmatpush3.bf16.msra.mxu0 %v1715_v9  ;;  %1623 = vmatpush3.bf16.msra.mxu1 %v1715_v9 }
  0x6e   : > { %1509 = vmatprep.subr.bf16.mxu0 %v1716_v10  ;;  %1616 = vmatprep.subr.bf16.mxu1 %v1716_v10 }
  0x71   : > { %1510 = vmatpush3.bf16.msra.mxu0 %v1717_v13  ;;  %1624 = vmatpush3.bf16.msra.mxu1 %v1717_v13 }
  0x72   : > { %1511 = vmatprep.subr.bf16.mxu0 %v1718_v14  ;;  %1617 = vmatprep.subr.bf16.mxu1 %v1718_v14 }
  0x75   : > { %1512 = vmatpush3.bf16.msra.mxu0 %v1719_v15  ;;  %1625 = vmatpush3.bf16.msra.mxu1 %v1719_v15 }
  0x76   : > { %1513 = vmatprep.subr.bf16.mxu0 %v1720_v16  ;;  %1618 = vmatprep.subr.bf16.mxu1 %v1720_v16 }
  0x79   : > { %1514 = vmatpush3.bf16.msra.mxu0 %v1721_v17  ;;  %1626 = vmatpush3.bf16.msra.mxu1 %v1721_v17 }
  0x7c   : > { %681 = vmatmul.mubr.bf16.vlgmr.msra.gmra.mrb[0].mxu0 %v1722_v18  ;;  %745 = vmatmul.mubr.bf16.vlgmr.msra.gmra.mrb[0].mxu1 %v1725_v19 }
  0x7d   : > { %688 = vmatprep.mubr.bf16.mxu0 %v1728_v20  ;;  %752 = vmatprep.mubr.bf16.mxu1 %v1730_v21 }
  0x84   : > { %689 = vmatmul.mubr.bf16.gmra.mrb[4].mxu0 %v1732_v22  ;;  %753 = vmatmul.mubr.bf16.gmra.mrb[4].mxu1 %v1733_v23 }
  0x85   : > { %696 = vmatprep.mubr.bf16.mxu0 %v1734_v24  ;;  %760 = vmatprep.mubr.bf16.mxu1 %v1736_v25 }
  0x8c   : > { %697 = vmatmul.mubr.bf16.gmra.mrb[8].mxu0 %v1738_v26  ;;  %761 = vmatmul.mubr.bf16.gmra.mrb[8].mxu1 %v1739_v27 }
  0x8d   : > { %704 = vmatprep.mubr.bf16.mxu0 %v1740_v28  ;;  %768 = vmatprep.mubr.bf16.mxu1 %v1742_v29 }
  0x94   : > { %705 = vmatmul.mubr.bf16.gmra.mrb[12].mxu0 %v1744_v30  ;;  %769 = vmatmul.mubr.bf16.gmra.mrb[12].mxu1 %v1745_v31 }
  0x95   : > { %712 = vmatprep.mubr.bf16.mxu0 %v1746_v32  ;;  %776 = vmatprep.mubr.bf16.mxu1 %v1748_v33 }
  0x9c   : > { %713 = vmatmul.mubr.bf16.gmra.mrb[16].mxu0 %v1750_v34  ;;  %777 = vmatmul.mubr.bf16.gmra.mrb[16].mxu1 %v1751_v35 }
  0x9d   : > { %720 = vmatprep.mubr.bf16.mxu0 %v1752_v36  ;;  %784 = vmatprep.mubr.bf16.mxu1 %v1754_v37 }
  0xa4   : > { %721 = vmatmul.mubr.bf16.gmra.mrb[20].mxu0 %v1756_v38  ;;  %785 = vmatmul.mubr.bf16.gmra.mrb[20].mxu1 %v1757_v39 }
  0xa5   : > { %728 = vmatprep.mubr.bf16.mxu0 %v1758_v40  ;;  %792 = vmatprep.mubr.bf16.mxu1 %v1760_v41 }
  0xac   : > { %729 = vmatmul.mubr.bf16.gmra.mrb[24].mxu0 %v1762_v42  ;;  %793 = vmatmul.mubr.bf16.gmra.mrb[24].mxu1 %v1763_v43 }
  0xad   : > { %736 = vmatprep.mubr.bf16.mxu0 %v1764_v44  ;;  %800 = vmatprep.mubr.bf16.mxu1 %v1766_v45 }
  0xb4   : > { %737 = vmatmul.mubr.bf16.gmra.mrb[28].mxu0 %v1768_v46  ;;  %801 = vmatmul.mubr.bf16.gmra.mrb[28].mxu1 %v1769_v47 }
 0x14f   : > { %v1515_v48 = vpop.f32.mrb[0].mxu0  ;;  %v1563_v49 = vpop.f32.mrb[0].mxu1 }
 0x150   : > { %v1516_v50 = vpop.f32.mrb[1].mxu0  ;;  %v1564_v52 = vpop.f32.mrb[1].mxu1 }
 0x151   : > { %v1517_v53 = vadd.f32 %v1516_v50, %v1515_v48  ;;  %v1565_v54 = vadd.f32 %v1564_v52, %v1563_v49  ;;  %v1518_v55 = vpop.f32.mrb[2].mxu0  ;;  %v1566_v56 = vpop.f32.mrb[2].mxu1 }
 0x152   : > { %v1519_v57 = vpop.f32.mrb[3].mxu0  ;;  %v1567_v58 = vpop.f32.mrb[3].mxu1 }
 0x153   : > { %v915_v59 = vadd.f32 %v1517_v53, %v2146_v51  ;;  %v931_v60 = vadd.f32 %v1565_v54, %v2146_v51  ;;  %v1520_v61 = vadd.f32 %v1519_v57, %v1518_v55  ;;  %v1568_v62 = vadd.f32 %v1567_v58, %v1566_v56 }
 0x155   : > { %v916_v63 = vadd.f32 %v1520_v61, %v2146_v51  ;;  %v932_v0 = vadd.f32 %v1568_v62, %v2146_v51  ;;  %v947_v1 = vmax.f32 %v915_v59, 0.0  ;;  %v963_v2 = vmax.f32 %v931_v60, 0.0 }
 0x157   : > { %v948_v3 = vmax.f32 %v916_v63, 0.0  ;;  %v964_v4 = vmax.f32 %v932_v0, 0.0  ;;  %v1521_v5 = vpop.f32.mrb[4].mxu0  ;;  %v1569_v6 = vpop.f32.mrb[4].mxu1 }
 0x158   : > { %v1522_v7 = vpop.f32.mrb[5].mxu0  ;;  %v1570_v8 = vpop.f32.mrb[5].mxu1 }
 0x159   : > { %v1407_v9 = vpack.c.bf16 %v948_v3, %v947_v1  ;;  %v1447_v10 = vpack.c.bf16 %v964_v4, %v963_v2  ;;  %v1523_v11 = vadd.f32 %v1522_v7, %v1521_v5  ;;  %v1571_v12 = vadd.f32 %v1570_v8, %v1569_v6  ;;  %v1524_v13 = vpop.f32.mrb[6].mxu0  ;;  %v1572_v14 = vpop.f32.mrb[6].mxu1 }
 0x15a   : > { %v1525_v15 = vpop.f32.mrb[7].mxu0  ;;  %v1573_v16 = vpop.f32.mrb[7].mxu1 }
 0x15b   : > { %1408 = vst [vmem:[%s2153_s9] sm:$0xff] %v1407_v9   ;;  %1491 = vst [vmem:[%s2153_s9 + $0x40] sm:$0xff] %v1447_v10   ;;  %v917_v17 = vadd.f32 %v1523_v11, %v2146_v51  ;;  %v933_v18 = vadd.f32 %v1571_v12, %v2146_v51  ;;  %v1526_v19 = vadd.f32 %v1525_v15, %v1524_v13 }
 0x15c   : > { %v1574_v20 = vadd.f32 %v1573_v16, %v1572_v14 }
 0x15d   : > { %v918_v21 = vadd.f32 %v1526_v19, %v2146_v51  ;;  %v949_v23 = vmax.f32 %v917_v17, 0.0  ;;  %v965_v24 = vmax.f32 %v933_v18, 0.0 }
 0x15e   : > { %v934_v22 = vadd.f32 %v1574_v20, %v2146_v51 }
 0x15f   : > { %v950_v25 = vmax.f32 %v918_v21, 0.0  ;;  %v1527_v27 = vpop.f32.mrb[8].mxu0  ;;  %v1575_v28 = vpop.f32.mrb[8].mxu1 }
 0x160   : > { %v966_v26 = vmax.f32 %v934_v22, 0.0  ;;  %v1528_v29 = vpop.f32.mrb[9].mxu0  ;;  %v1576_v30 = vpop.f32.mrb[9].mxu1 }
 0x161   : > { %v1412_v31 = vpack.c.bf16 %v950_v25, %v949_v23  ;;  %v1529_v33 = vadd.f32 %v1528_v29, %v1527_v27  ;;  %v1577_v34 = vadd.f32 %v1576_v30, %v1575_v28  ;;  %v1530_v35 = vpop.f32.mrb[10].mxu0  ;;  %v1578_v36 = vpop.f32.mrb[10].mxu1 }
 0x162   : > { %v1452_v32 = vpack.c.bf16 %v966_v26, %v965_v24  ;;  %v1531_v37 = vpop.f32.mrb[11].mxu0  ;;  %v1579_v38 = vpop.f32.mrb[11].mxu1 }
 0x163   : > { %1484 = vst [vmem:[%s2153_s9 + $0x8] sm:$0xff] %v1412_v31   ;;  %v919_v39 = vadd.f32 %v1529_v33, %v2146_v51  ;;  %v935_v40 = vadd.f32 %v1577_v34, %v2146_v51  ;;  %v1532_v41 = vadd.f32 %v1531_v37, %v1530_v35  ;;  %v1580_v42 = vadd.f32 %v1579_v38, %v1578_v36 }
 0x164   : > { %1492 = vst [vmem:[%s2153_s9 + $0x48] sm:$0xff] %v1452_v32  }
 0x165   : > { %v920_v43 = vadd.f32 %v1532_v41, %v2146_v51  ;;  %v936_v44 = vadd.f32 %v1580_v42, %v2146_v51  ;;  %v951_v45 = vmax.f32 %v919_v39, 0.0  ;;  %v967_v46 = vmax.f32 %v935_v40, 0.0 }
 0x167   : > { %v952_v47 = vmax.f32 %v920_v43, 0.0  ;;  %v968_v48 = vmax.f32 %v936_v44, 0.0  ;;  %v1533_v49 = vpop.f32.mrb[12].mxu0  ;;  %v1581_v50 = vpop.f32.mrb[12].mxu1 }
 0x168   : > { %v1534_v52 = vpop.f32.mrb[13].mxu0  ;;  %v1582_v53 = vpop.f32.mrb[13].mxu1 }
 0x169   : > { %v1417_v54 = vpack.c.bf16 %v952_v47, %v951_v45  ;;  %v1457_v55 = vpack.c.bf16 %v968_v48, %v967_v46  ;;  %v1535_v56 = vadd.f32 %v1534_v52, %v1533_v49  ;;  %v1583_v57 = vadd.f32 %v1582_v53, %v1581_v50  ;;  %v1536_v58 = vpop.f32.mrb[14].mxu0  ;;  %v1584_v59 = vpop.f32.mrb[14].mxu1 }
 0x16a   : > { %v1537_v60 = vpop.f32.mrb[15].mxu0  ;;  %v1585_v61 = vpop.f32.mrb[15].mxu1 }
 0x16b   : > { %1485 = vst [vmem:[%s2153_s9 + $0x10] sm:$0xff] %v1417_v54   ;;  %1493 = vst [vmem:[%s2153_s9 + $0x50] sm:$0xff] %v1457_v55   ;;  %v921_v62 = vadd.f32 %v1535_v56, %v2146_v51  ;;  %v937_v63 = vadd.f32 %v1583_v57, %v2146_v51  ;;  %v1538_v0 = vadd.f32 %v1537_v60, %v1536_v58 }
 0x16c   : > { %v1586_v1 = vadd.f32 %v1585_v61, %v1584_v59 }
 0x16d   : > { %v922_v2 = vadd.f32 %v1538_v0, %v2146_v51  ;;  %v953_v4 = vmax.f32 %v921_v62, 0.0  ;;  %v969_v5 = vmax.f32 %v937_v63, 0.0 }
 0x16e   : > { %v938_v3 = vadd.f32 %v1586_v1, %v2146_v51 }
 0x16f   : > { %v954_v6 = vmax.f32 %v922_v2, 0.0  ;;  %v1539_v8 = vpop.f32.mrb[16].mxu0  ;;  %v1587_v9 = vpop.f32.mrb[16].mxu1 }
 0x170   : > { %v970_v7 = vmax.f32 %v938_v3, 0.0  ;;  %v1540_v10 = vpop.f32.mrb[17].mxu0  ;;  %v1588_v11 = vpop.f32.mrb[17].mxu1 }
 0x171   : > { %v1422_v12 = vpack.c.bf16 %v954_v6, %v953_v4  ;;  %v1541_v14 = vadd.f32 %v1540_v10, %v1539_v8  ;;  %v1589_v15 = vadd.f32 %v1588_v11, %v1587_v9  ;;  %v1542_v16 = vpop.f32.mrb[18].mxu0  ;;  %v1590_v17 = vpop.f32.mrb[18].mxu1 }
 0x172   : > { %v1462_v13 = vpack.c.bf16 %v970_v7, %v969_v5  ;;  %v1543_v18 = vpop.f32.mrb[19].mxu0  ;;  %v1591_v19 = vpop.f32.mrb[19].mxu1 }
 0x173   : > { %1486 = vst [vmem:[%s2153_s9 + $0x18] sm:$0xff] %v1422_v12   ;;  %v923_v20 = vadd.f32 %v1541_v14, %v2146_v51  ;;  %v939_v21 = vadd.f32 %v1589_v15, %v2146_v51  ;;  %v1544_v22 = vadd.f32 %v1543_v18, %v1542_v16  ;;  %v1592_v23 = vadd.f32 %v1591_v19, %v1590_v17 }
 0x174   : > { %1494 = vst [vmem:[%s2153_s9 + $0x58] sm:$0xff] %v1462_v13  }
 0x175   : > { %v924_v24 = vadd.f32 %v1544_v22, %v2146_v51  ;;  %v940_v25 = vadd.f32 %v1592_v23, %v2146_v51  ;;  %v955_v26 = vmax.f32 %v923_v20, 0.0  ;;  %v971_v27 = vmax.f32 %v939_v21, 0.0 }
 0x177   : > { %v956_v28 = vmax.f32 %v924_v24, 0.0  ;;  %v972_v29 = vmax.f32 %v940_v25, 0.0  ;;  %v1545_v30 = vpop.f32.mrb[20].mxu0  ;;  %v1593_v31 = vpop.f32.mrb[20].mxu1 }
 0x178   : > { %v1546_v32 = vpop.f32.mrb[21].mxu0  ;;  %v1594_v33 = vpop.f32.mrb[21].mxu1 }
 0x179   : > { %v1427_v34 = vpack.c.bf16 %v956_v28, %v955_v26  ;;  %v1467_v35 = vpack.c.bf16 %v972_v29, %v971_v27  ;;  %v1547_v36 = vadd.f32 %v1546_v32, %v1545_v30  ;;  %v1595_v37 = vadd.f32 %v1594_v33, %v1593_v31  ;;  %v1548_v38 = vpop.f32.mrb[22].mxu0  ;;  %v1596_v39 = vpop.f32.mrb[22].mxu1 }
 0x17a   : > { %v1549_v40 = vpop.f32.mrb[23].mxu0  ;;  %v1597_v41 = vpop.f32.mrb[23].mxu1 }
 0x17b   : > { %1487 = vst [vmem:[%s2153_s9 + $0x20] sm:$0xff] %v1427_v34   ;;  %1495 = vst [vmem:[%s2153_s9 + $0x60] sm:$0xff] %v1467_v35   ;;  %v925_v42 = vadd.f32 %v1547_v36, %v2146_v51  ;;  %v941_v43 = vadd.f32 %v1595_v37, %v2146_v51  ;;  %v1550_v44 = vadd.f32 %v1549_v40, %v1548_v38 }
 0x17c   : > { %v1598_v45 = vadd.f32 %v1597_v41, %v1596_v39 }
 0x17d   : > { %v926_v46 = vadd.f32 %v1550_v44, %v2146_v51  ;;  %v957_v48 = vmax.f32 %v925_v42, 0.0  ;;  %v973_v49 = vmax.f32 %v941_v43, 0.0 }
 0x17e   : > { %v942_v47 = vadd.f32 %v1598_v45, %v2146_v51 }
 0x17f   : > { %v958_v50 = vmax.f32 %v926_v46, 0.0  ;;  %v1551_v53 = vpop.f32.mrb[24].mxu0  ;;  %v1599_v54 = vpop.f32.mrb[24].mxu1 }
 0x180   : > { %v974_v52 = vmax.f32 %v942_v47, 0.0  ;;  %v1552_v55 = vpop.f32.mrb[25].mxu0  ;;  %v1600_v56 = vpop.f32.mrb[25].mxu1 }
 0x181   : > { %v1432_v57 = vpack.c.bf16 %v958_v50, %v957_v48  ;;  %v1553_v59 = vadd.f32 %v1552_v55, %v1551_v53  ;;  %v1601_v60 = vadd.f32 %v1600_v56, %v1599_v54  ;;  %v1554_v61 = vpop.f32.mrb[26].mxu0  ;;  %v1602_v62 = vpop.f32.mrb[26].mxu1 }
 0x182   : > { %v1472_v58 = vpack.c.bf16 %v974_v52, %v973_v49  ;;  %v1555_v63 = vpop.f32.mrb[27].mxu0  ;;  %v1603_v0 = vpop.f32.mrb[27].mxu1 }
 0x183   : > { %1488 = vst [vmem:[%s2153_s9 + $0x28] sm:$0xff] %v1432_v57   ;;  %v927_v1 = vadd.f32 %v1553_v59, %v2146_v51  ;;  %v943_v2 = vadd.f32 %v1601_v60, %v2146_v51  ;;  %v1556_v3 = vadd.f32 %v1555_v63, %v1554_v61  ;;  %v1604_v4 = vadd.f32 %v1603_v0, %v1602_v62 }
 0x184   : > { %1496 = vst [vmem:[%s2153_s9 + $0x68] sm:$0xff] %v1472_v58  }
 0x185   : > { %v928_v5 = vadd.f32 %v1556_v3, %v2146_v51  ;;  %v944_v6 = vadd.f32 %v1604_v4, %v2146_v51  ;;  %v959_v7 = vmax.f32 %v927_v1, 0.0  ;;  %v975_v8 = vmax.f32 %v943_v2, 0.0 }
 0x187   : > { %v960_v9 = vmax.f32 %v928_v5, 0.0  ;;  %v976_v10 = vmax.f32 %v944_v6, 0.0  ;;  %v1557_v11 = vpop.f32.mrb[28].mxu0  ;;  %v1605_v12 = vpop.f32.mrb[28].mxu1 }
 0x188   : > { %v1558_v13 = vpop.f32.mrb[29].mxu0  ;;  %v1606_v14 = vpop.f32.mrb[29].mxu1 }
 0x189   : > { %v1437_v15 = vpack.c.bf16 %v960_v9, %v959_v7  ;;  %v1477_v16 = vpack.c.bf16 %v976_v10, %v975_v8  ;;  %v1559_v17 = vadd.f32 %v1558_v13, %v1557_v11  ;;  %v1607_v18 = vadd.f32 %v1606_v14, %v1605_v12  ;;  %v1560_v19 = vpop.f32.mrb[30].mxu0  ;;  %v1608_v20 = vpop.f32.mrb[30].mxu1 }
 0x18a   : > { %v1561_v21 = vpop.f32.mrb[31].mxu0  ;;  %v1609_v22 = vpop.f32.mrb[31].mxu1 }
 0x18b   : > { %1489 = vst [vmem:[%s2153_s9 + $0x30] sm:$0xff] %v1437_v15   ;;  %1497 = vst [vmem:[%s2153_s9 + $0x70] sm:$0xff] %v1477_v16   ;;  %v929_v23 = vadd.f32 %v1559_v17, %v2146_v51  ;;  %v945_v24 = vadd.f32 %v1607_v18, %v2146_v51  ;;  %v1562_v25 = vadd.f32 %v1561_v21, %v1560_v19 }
 0x18c   : > { %v1610_v26 = vadd.f32 %v1609_v22, %v1608_v20 }
 0x18d   : > { %v930_v27 = vadd.f32 %v1562_v25, %v2146_v51  ;;  %v961_v29 = vmax.f32 %v929_v23, 0.0  ;;  %v977_v30 = vmax.f32 %v945_v24, 0.0 }
 0x18e   : > { %v946_v28 = vadd.f32 %v1610_v26, %v2146_v51 }
 0x18f   : > { %v962_v31 = vmax.f32 %v930_v27, 0.0 }
 0x190   : > { %v978_v32 = vmax.f32 %v946_v28, 0.0 }
 0x191   : > { %v1442_v33 = vpack.c.bf16 %v962_v31, %v961_v29 }
 0x192   : > { %v1482_v34 = vpack.c.bf16 %v978_v32, %v977_v30 }
 0x193   : > { %1490 = vst [vmem:[%s2153_s9 + $0x38] sm:$0xff] %v1442_v33  }
 0x194   : > { %1498 = vst [vmem:[%s2153_s9 + $0x78] sm:$0xff] %v1482_v34  }
 0x195   : > { %1841 = shalt.err (!%p1838_p5)
}
 0x196   : > { %s1842_s29 = scalar_lea.hbm %s2202_s7, 2048  ;;  %s1846_s20 = scalar_lea.hbm %s2258_s3, 4096 }
 0x197   : > { %p1843_p9 = scmp.ne.s32.totalorder %s2202_s7, %s1842_s29  ;;  %p1847_p3 = scmp.lt.u32.totalorder %s2202_s7, %s2258_s3 }
 0x198   : > { %p1848_p7 = scmp.lt.u32.totalorder %s1846_s20, %s1842_s29  ;;  %p1850_p4 = scmp.lt.u32.totalorder %s1842_s29, %s2202_s7 }
 0x199   : > { %p1844_p1 = pnand %p1843_p9, %p2041_p10 }
 0x19a   : > { %p1849_p13 = por %p1848_p7, %p1847_p3 }
 0x19b   : > { %p1845_p2 = pneg %p1844_p1 }
 0x19c   : > { %p1851_p6 = por %p1850_p4, %p1849_p13 }
 0x19e   : > { %p1852_p8 = pnand %p1851_p6, %p1845_p2 }
 0x1a0   : > { %1855 = shalt.err (!%p1852_p8)
}
 0x1a1   : > { %s1923_s9 = smov 64   ;;  %s1924_s10 = smov 4  }
 0x1a2   : > { %1633 = dma.vmem_to_hbm [thread:$0]  (%p2041_p10), %s2204_s11, 2048, %s2202_s7, %s1140_s15, %s1923_s9, %s1923_s9, %s1924_s10  }
 0x1a3 PF: > { %s1169_s18 = sand.u32 1, %s1894_s12   ;;  %p2276_p12 = scmp.ne.s32.totalorder %s2266_s23, 0 }
 0x1a4   : > { %p2277_p11 = scmp.ge.s32.totalorder %s1914_s17, 2  ;;  %s1170_s26 = scalar_lea.sflag [#allocation5], %s1169_s18 }
 0x1a6   : > { %p1644_p0 = pnand %p2277_p11, %p2276_p12 }
 0x1a8   : > { %1889 = dma.done.wait (!%p1644_p0), %s1170_s26, 2048  }
 0x1a9   : > { %1891 = vsyncadd (!%p1644_p0), %s1170_s26, 4294965248  ;;  %s20_s17 = sadd.s32 1, %s1914_s17   ;;  %s2278_s12 = smov %s1898_s13 }
 0x1aa   : > { %p17_p5 = scmp.ge.s32.totalorder %s20_s17, 4   ;;  %s2279_s13 = smov %s1902_s14 }
 0x1ab   : > { %s2280_s14 = smov %s2050_s5  ;;  %s2281_s15 = smov %s1910_s16 }
 0x1ac   : > { %s2282_s16 = smov %s2284_s28  ;;  %19 = sbr.rel (!%p17_p5) target bundleno = 7 (0x7), region = 93 }
 0x1b3   :  { %1175 = vsyncpa [#allocation4], 1 }
 0x1b4   :  { %1177 = vsyncpa [#allocation4 + $0x1], 1 }
 0x1b5   :  { %1178 = vsyncpa [#allocation7], 1 }
 0x1b6   :  { %1179 = vsyncpa [#allocation5], 1 }
 0x1b7   :  { %1181 = vsyncpa [#allocation5 + $0x1], 1 }

</bundles_post_ra>
